<compile_context>
chip_gen: v5e
topology: v5e:2x2
jax: 0.10.0
libtpu: 0.0.40
codegen_flags: <defaults>
</compile_context>

<pallas_src>
import functools

import jax
import jax.numpy as jnp
from jax import lax
from jax.experimental import pallas as pl
from jax.experimental.pallas import tpu as pltpu

block_size = 8      # max sequence length (causal mask size)
nb_embed = 32       # C
head_size = nb_embed

_HI = jax.lax.Precision.HIGHEST


def _head_kernel(x_ref, wq_ref, wk_ref, wv_ref, bias_ref, o_ref, *, scale):
    # x_ref:    (R, C)  with R = batch_block * seq_len (batch-major, time-minor rows)
    # w*_ref:   (C, H)  projection weights, stored as (in, out) so y = x @ W
    # bias_ref: (R, R)  additive mask: 0 where attendable, -inf elsewhere
    # o_ref:    (R, H)
    x = x_ref[...]

    # Projections: f32-faithful MXU matmuls (matches nn.Linear(bias=False) in f32).
    q = jnp.dot(x, wq_ref[...], preferred_element_type=jnp.float32, precision=_HI)
    k = jnp.dot(x, wk_ref[...], preferred_element_type=jnp.float32, precision=_HI)
    v = jnp.dot(x, wv_ref[...], preferred_element_type=jnp.float32, precision=_HI)

    # Attention scores for every row pair, contracting the head dim directly
    # (equivalent to q @ k.T without materializing a transpose).
    wei = lax.dot_general(q, k, (((1,), (1,)), ((), ())),
                          preferred_element_type=jnp.float32,
                          precision=_HI) * scale                     # (R, R)

    # Block-diagonal causal mask as an additive bias (0 / -inf), like masked_fill.
    wei = wei + bias_ref[...]

    # Numerically stable softmax along the last axis (diagonal is never masked,
    # so every row max is finite). Exact division, no approximate reciprocal.
    wei = wei - jnp.max(wei, axis=-1, keepdims=True)
    p = jnp.exp(wei)
    p = p / jnp.sum(p, axis=-1, keepdims=True)

    o_ref[...] = jnp.dot(p, v, preferred_element_type=jnp.float32,
                         precision=_HI).astype(o_ref.dtype)          # (R, H)


def head_forward(x, wq, wk, wv, *, batch_block=None):
    """x: (B, T, C) float32; wq/wk/wv: (C, H) float32 (stored as (in, out)).

    Returns (B, T, H) float32, identical to the PyTorch Head.forward.
    """
    B, T, C = x.shape
    H = wq.shape[1]

    # Pick how many sequences share one grid step. For tiny B (like the test) this
    # is all of them -> a single invocation. For larger B, aim for a few hundred
    # rows per step so the projections fill MXU rows while the (rows x rows) score
    # tile stays modest (also keeps VMEM use small on v7x's 64 MiB).
    if batch_block is None:
        if B * T <= 512:
            batch_block = B
        else:
            target = max(1, 512 // T)
            batch_block = max(d for d in range(1, min(B, target) + 1) if B % d == 0)
    assert B % batch_block == 0, "B must be divisible by batch_block"
    num_blocks = B // batch_block
    rows = batch_block * T

    # Flatten (B, T) into rows outside the kernel (free reshape at the XLA level).
    x2d = x.reshape(B * T, C)

    # Block-diagonal causal additive bias, identical for every grid step (the
    # Pallas analogue of the module's registered `tril` buffer): keep (row, col)
    # only if both rows belong to the same sequence AND col <= row.
    r = jnp.arange(rows, dtype=jnp.int32)
    same_seq = (r[:, None] // T) == (r[None, :] // T)
    causal = r[None, :] <= r[:, None]
    bias = jnp.where(same_seq & causal, 0.0, -jnp.inf).astype(jnp.float32)

    kernel = functools.partial(_head_kernel, scale=float(C) ** -0.5)

    out2d = pl.pallas_call(
        kernel,
        out_shape=jax.ShapeDtypeStruct((B * T, H), jnp.float32),
        grid_spec=pltpu.PrefetchScalarGridSpec(
            num_scalar_prefetch=0,
            grid=(num_blocks,),
            in_specs=[
                pl.BlockSpec((rows, C), lambda b: (b, 0)),
                pl.BlockSpec((C, H), lambda b: (0, 0)),       # resident across steps
                pl.BlockSpec((C, H), lambda b: (0, 0)),
                pl.BlockSpec((C, H), lambda b: (0, 0)),
                pl.BlockSpec((rows, rows), lambda b: (0, 0)),  # resident across steps
            ],
            out_specs=pl.BlockSpec((rows, H), lambda b: (b, 0)),
        ),
        compiler_params=pltpu.CompilerParams(
            # Batch-block axis is independent -> shardable across TensorCores.
            dimension_semantics=("parallel",),
        ),
    )(x2d, wq, wk, wv, bias)

    return out2d.reshape(B, T, H)


def _reference(x, wq, wk, wv):
    B, T, C = x.shape
    q = jnp.einsum("btc,ch->bth", x, wq, precision=_HI)
    k = jnp.einsum("btc,ch->bth", x, wk, precision=_HI)
    v = jnp.einsum("btc,ch->bth", x, wv, precision=_HI)
    wei = jnp.einsum("bth,bsh->bts", q, k, precision=_HI) * (C ** -0.5)
    tril = jnp.tril(jnp.ones((T, T), dtype=bool))
    wei = jnp.where(tril[None], wei, -jnp.inf)
    wei = jax.nn.softmax(wei, axis=-1)
    return jnp.einsum("bts,bsh->bth", wei, v, precision=_HI)


if __name__ == "__main__":
    key = jax.random.PRNGKey(0)
    k_x, k_q, k_k, k_v = jax.random.split(key, 4)

    B, T, C, H = 2, block_size, nb_embed, head_size
    x = jax.random.normal(k_x, (B, T, C), dtype=jnp.float32)

    # Deterministic synthetic parameters (Linear weights stored as (in, out)).
    init_scale = 1.0 / jnp.sqrt(jnp.float32(C))
    wq = jax.random.normal(k_q, (C, H), dtype=jnp.float32) * init_scale
    wk = jax.random.normal(k_k, (C, H), dtype=jnp.float32) * init_scale
    wv = jax.random.normal(k_v, (C, H), dtype=jnp.float32) * init_scale

    out = head_forward(x, wq, wk, wv)
    out = jax.block_until_ready(out)

    ref = _reference(x, wq, wk, wv)
    assert out.shape == (B, T, H)
    max_err = float(jnp.max(jnp.abs(out - ref)))
    assert jnp.allclose(out, ref, atol=1e-3, rtol=1e-3), (
        f"mismatch vs reference (max abs err = {max_err})")
    print("KERNEL_OK")
</pallas_src>

<mosaic_0001>
module attributes {stable_mosaic.version = 11 : i64} {
  func.func @_head_kernel(%arg0: i32, %arg1: memref<16x32xf32, #tpu.memory_space<vmem>>, %arg2: memref<32x32xf32, #tpu.memory_space<vmem>>, %arg3: memref<32x32xf32, #tpu.memory_space<vmem>>, %arg4: memref<32x32xf32, #tpu.memory_space<vmem>>, %arg5: memref<16x16xf32, #tpu.memory_space<vmem>>, %arg6: memref<16x32xf32, #tpu.memory_space<vmem>>) attributes {dimension_semantics = [#tpu.dimension_semantics<parallel>], iteration_bounds = array<i64: 1>, scalar_prefetch = 0 : i64, scratch_operands = 0 : i64, tpu.core_type = #tpu.core_type<tc>, window_params = [{transform_indices = @transform_0, window_bounds = array<i64: 16, 32>}, {pipeline_mode = #tpu.pipeline_mode<synchronous>, transform_indices = @transform_1, window_bounds = array<i64: 32, 32>}, {pipeline_mode = #tpu.pipeline_mode<synchronous>, transform_indices = @transform_2, window_bounds = array<i64: 32, 32>}, {pipeline_mode = #tpu.pipeline_mode<synchronous>, transform_indices = @transform_3, window_bounds = array<i64: 32, 32>}, {pipeline_mode = #tpu.pipeline_mode<synchronous>, transform_indices = @transform_4, window_bounds = array<i64: 16, 16>}, {transform_indices = @transform_5, window_bounds = array<i64: 16, 32>}]} {
    %c0 = arith.constant 0 : index
    %c0_0 = arith.constant 0 : index
    %0 = vector.load %arg1[%c0, %c0_0] : memref<16x32xf32, #tpu.memory_space<vmem>>, vector<16x32xf32>
    %c0_1 = arith.constant 0 : index
    %c0_2 = arith.constant 0 : index
    %1 = vector.load %arg2[%c0_1, %c0_2] : memref<32x32xf32, #tpu.memory_space<vmem>>, vector<32x32xf32>
    %cst = arith.constant dense<0.000000e+00> : vector<16x32xf32>
    %2 = tpu.matmul %0, %1, %cst {dimension_numbers = #tpu.dot_dimension_numbers<[1], [0], [0], [1], [0, 0, 1, 1], [], []>, precision = #tpu.contract_precision<fp32>} : vector<16x32xf32>, vector<32x32xf32>, vector<16x32xf32> -> vector<16x32xf32>
    %c0_3 = arith.constant 0 : index
    %c0_4 = arith.constant 0 : index
    %3 = vector.load %arg3[%c0_3, %c0_4] : memref<32x32xf32, #tpu.memory_space<vmem>>, vector<32x32xf32>
    %cst_5 = arith.constant dense<0.000000e+00> : vector<16x32xf32>
    %4 = tpu.matmul %0, %3, %cst_5 {dimension_numbers = #tpu.dot_dimension_numbers<[1], [0], [0], [1], [0, 0, 1, 1], [], []>, precision = #tpu.contract_precision<fp32>} : vector<16x32xf32>, vector<32x32xf32>, vector<16x32xf32> -> vector<16x32xf32>
    %c0_6 = arith.constant 0 : index
    %c0_7 = arith.constant 0 : index
    %5 = vector.load %arg4[%c0_6, %c0_7] : memref<32x32xf32, #tpu.memory_space<vmem>>, vector<32x32xf32>
    %cst_8 = arith.constant dense<0.000000e+00> : vector<16x32xf32>
    %6 = tpu.matmul %0, %5, %cst_8 {dimension_numbers = #tpu.dot_dimension_numbers<[1], [0], [0], [1], [0, 0, 1, 1], [], []>, precision = #tpu.contract_precision<fp32>} : vector<16x32xf32>, vector<32x32xf32>, vector<16x32xf32> -> vector<16x32xf32>
    %cst_9 = arith.constant dense<0.000000e+00> : vector<16x16xf32>
    %7 = tpu.matmul %2, %4, %cst_9 {dimension_numbers = #tpu.dot_dimension_numbers<[1], [1], [0], [0], [0, 0, 1, 0], [], []>, precision = #tpu.contract_precision<fp32>} : vector<16x32xf32>, vector<16x32xf32>, vector<16x16xf32> -> vector<16x16xf32>
    %cst_10 = arith.constant 0.176776692 : f32
    %8 = vector.broadcast %cst_10 : f32 to vector<16x16xf32>
    %9 = arith.mulf %7, %8 : vector<16x16xf32>
    %c0_11 = arith.constant 0 : index
    %c0_12 = arith.constant 0 : index
    %10 = vector.load %arg5[%c0_11, %c0_12] : memref<16x16xf32, #tpu.memory_space<vmem>>, vector<16x16xf32>
    %11 = arith.addf %9, %10 : vector<16x16xf32>
    %cst_13 = arith.constant dense<0xFF800000> : vector<16xf32>
    %12 = vector.multi_reduction <maximumf>, %11, %cst_13 [1] : vector<16x16xf32> to vector<16xf32>
    %13 = vector.shape_cast %12 : vector<16xf32> to vector<16x1xf32>
    %14 = vector.broadcast %13 : vector<16x1xf32> to vector<16x16xf32>
    %15 = arith.subf %11, %14 : vector<16x16xf32>
    %16 = math.exp %15 : vector<16x16xf32>
    %cst_14 = arith.constant dense<0.000000e+00> : vector<16xf32>
    %17 = vector.multi_reduction <add>, %16, %cst_14 [1] : vector<16x16xf32> to vector<16xf32>
    %18 = vector.shape_cast %17 : vector<16xf32> to vector<16x1xf32>
    %19 = vector.broadcast %18 : vector<16x1xf32> to vector<16x16xf32>
    %20 = arith.divf %16, %19 : vector<16x16xf32>
    %cst_15 = arith.constant dense<0.000000e+00> : vector<16x32xf32>
    %21 = tpu.matmul %20, %6, %cst_15 {dimension_numbers = #tpu.dot_dimension_numbers<[1], [0], [0], [1], [0, 0, 1, 1], [], []>, precision = #tpu.contract_precision<fp32>} : vector<16x16xf32>, vector<16x32xf32>, vector<16x32xf32> -> vector<16x32xf32>
    %c0_16 = arith.constant 0 : index
    %c0_17 = arith.constant 0 : index
    %22 = vector.load %arg6[%c0_16, %c0_17] : memref<16x32xf32, #tpu.memory_space<vmem>>, vector<16x32xf32>
    tpu.vector_store %arg6[%c0_16, %c0_17], %21 {strides = array<i32>} : memref<16x32xf32, #tpu.memory_space<vmem>>, vector<16x32xf32>,
    return
  }
  func.func @transform_0(%arg0: i32) -> (i32, i32) {
    %c0_i32 = arith.constant 0 : i32
    %c0_i32_0 = arith.constant 0 : i32
    return %arg0, %c0_i32 : i32, i32
  }
  func.func @transform_1(%arg0: i32) -> (i32, i32) {
    %c0_i32 = arith.constant 0 : i32
    %c0_i32_0 = arith.constant 0 : i32
    %c0_i32_1 = arith.constant 0 : i32
    return %c0_i32, %c0_i32_0 : i32, i32
  }
  func.func @transform_2(%arg0: i32) -> (i32, i32) {
    %c0_i32 = arith.constant 0 : i32
    %c0_i32_0 = arith.constant 0 : i32
    %c0_i32_1 = arith.constant 0 : i32
    return %c0_i32, %c0_i32_0 : i32, i32
  }
  func.func @transform_3(%arg0: i32) -> (i32, i32) {
    %c0_i32 = arith.constant 0 : i32
    %c0_i32_0 = arith.constant 0 : i32
    %c0_i32_1 = arith.constant 0 : i32
    return %c0_i32, %c0_i32_0 : i32, i32
  }
  func.func @transform_4(%arg0: i32) -> (i32, i32) {
    %c0_i32 = arith.constant 0 : i32
    %c0_i32_0 = arith.constant 0 : i32
    %c0_i32_1 = arith.constant 0 : i32
    return %c0_i32, %c0_i32_0 : i32, i32
  }
  func.func @transform_5(%arg0: i32) -> (i32, i32) {
    %c0_i32 = arith.constant 0 : i32
    %c0_i32_0 = arith.constant 0 : i32
    return %arg0, %c0_i32 : i32, i32
  }
}

</mosaic_0001>

<bundles_post_ra>
// kernel: tpu_custom_call.1
= control target key start
LH: loop header
LB: loop body
LE: loop exit
PB: predicated region body
PF: predicated region fallthrough
CT: control target
= control target key end

     0   :  { %10 = vsyncpa [#allocation3], 0  ;;  %s1630_s0 = inlined_call_operand.hbm [shape: f32[16,32], index: 0, kind: input, shape index: {}]   ;;  %s1631_s1 = inlined_call_operand.hbm [shape: f32[32,32], index: 1, kind: input, shape index: {}]   ;;  %s1632_s2 = inlined_call_operand.hbm [shape: f32[32,32], index: 2, kind: input, shape index: {}]   ;;  %s1633_s3 = inlined_call_operand.hbm [shape: f32[32,32], index: 3, kind: input, shape index: {}]   ;;  %s1634_s4 = inlined_call_operand.hbm [shape: f32[16,16], index: 4, kind: input, shape index: {}]   ;;  %s1635_s5 = inlined_call_operand.hbm [shape: f32[16,32], index: 5, kind: output, shape index: {}]  }
   0x1   :  { %11 = vsyncpa [#allocation6], 0 }
   0x2   :  { %12 = vsyncpa [#allocation9], 0 }
   0x3   :  { %13 = vsyncpa [#allocation4], 0  ;;  %s31_s20 = sshll.u32 %s1631_s1, 4  ;;  %s1420_s21 = smov [#allocation5]   ;;  %s32_s20 = int_to_ptr.hbm [resolvable:$true] %s31_s20 }
   0x4   :  { %s33_s22 = sshll.u32 %s1420_s21, 4  ;;  %s57_s25 = sshll.u32 %s1633_s3, 4  ;;  %s34_s22 = int_to_ptr.vmem [resolvable:$true] %s33_s22  ;;  %s58_s25 = int_to_ptr.hbm [resolvable:$true] %s57_s25 }
   0x5   :  { %s1421_s26 = smov 128   ;;  %s1422_s27 = smov 8  }
   0x6   :  { %39 = dma.hbm_to_vmem [thread:$0]  %s32_s20, 512, %s34_s22, [#allocation6], %s1421_s26, %s1421_s26, %s1422_s27  }
   0x7   :  { %s1423_s28 = smov [#allocation8]   ;;  %s18_s1 = sshll.u32 %s1630_s0, 4  ;;  %s19_s1 = int_to_ptr.hbm [resolvable:$true] %s18_s1 }
   0x8   :  { %s59_s29 = sshll.u32 %s1423_s28, 4  ;;  %s44_s8 = sshll.u32 %s1632_s2, 4  ;;  %s60_s29 = int_to_ptr.vmem [resolvable:$true] %s59_s29  ;;  %s45_s8 = int_to_ptr.hbm [resolvable:$true] %s44_s8 }
   0x9   :  { %65 = dma.hbm_to_vmem [thread:$0]  %s58_s25, 512, %s60_s29, [#allocation9], %s1421_s26, %s1421_s26, %s1422_s27  }
   0xa   :  { %s1424_s9 = smov [#allocation2]   ;;  %s1425_s11 = smov [#allocation7]  }
   0xb   :  { %s20_s10 = sshll.u32 %s1424_s9, 4  ;;  %s46_s0 = sshll.u32 %s1425_s11, 4  ;;  %s21_s10 = int_to_ptr.vmem [resolvable:$true] %s20_s10  ;;  %s47_s0 = int_to_ptr.vmem [resolvable:$true] %s46_s0 }
   0xc   :  { %26 = dma.hbm_to_vmem [thread:$0]  %s19_s1, 256, %s21_s10, [#allocation3], %s1421_s26, %s1421_s26, %s1422_s27  }
   0xd   :  { %s70_s14 = sshll.u32 %s1634_s4, 4  ;;  %s1426_s2 = smov [#allocation10]   ;;  %s71_s14 = int_to_ptr.hbm [resolvable:$true] %s70_s14 }
   0xe   :  { %52 = dma.hbm_to_vmem [thread:$0]  %s45_s8, 512, %s47_s0, [#allocation6], %s1421_s26, %s1421_s26, %s1422_s27  }
   0xf   :  { %s72_s15 = sshll.u32 %s1426_s2, 4  ;;  %s73_s15 = int_to_ptr.vmem [resolvable:$true] %s72_s15 }
  0x10   :  { %78 = dma.hbm_to_vmem [thread:$0]  %s71_s14, 256, %s73_s15, [#allocation9], %s1421_s26, %s1421_s26, %s1422_s27  }
  0x11   :  { %1412 = dma.done.wait [#allocation3], 256  }
  0x12   :  { %1413 = vsyncadd [#allocation3], 4294967040 }
  0x13   :  { %1414 = dma.done.wait [#allocation6], 1024  }
  0x14   :  { %1415 = vsyncadd [#allocation6], 4294966272 }
  0x15   :  { %1416 = dma.done.wait [#allocation9], 768  }
  0x16   :  { %1417 = vsyncadd [#allocation9], 4294966528  ;;  %vm105_vm0 = vcmask 261120   ;;  %v104_v0 = vld [vmem:[#allocation5 + $0x18] sm:$0xff]  ;;  %v103_v1 = vld [vmem:[#allocation5 + $0x10] sm:$0xff]  ;;  %vm976_vm1 = vcmask 130048  }
  0x17   :  { %v102_v2 = vld [vmem:[#allocation5 + $0x8] sm:$0xff]  ;;  %v1488_v3 = vand.u32 4294901760, %v104_v0  ;;  %v1490_v4 = vand.u32 4294901760, %v103_v1  ;;  %v101_v6 = vld [vmem:[#allocation5] sm:$0xff]  ;;  %v100_v7 = vld [vmem:[#allocation2 + $0x8] sm:$0xff]  ;;  %s1427_s4 = smov [#allocation11]  }
  0x18   :  { %v1492_v5 = vand.u32 4294901760, %v102_v2  ;;  %v99_v8 = vld [vmem:[#allocation2] sm:$0xff]  ;;  %v1494_v9 = vand.u32 4294901760, %v101_v6  ;;  %v110_v10 = vsel %vm105_vm0, %v100_v7, 0  ;;  %v331_v16 = vld [vmem:[#allocation7 + $0x18] sm:$0xff]  ;;  %v329_v33 = vld [vmem:[#allocation7 + $0x8] sm:$0xff] }
  0x19   :  { %v107_v11 = vsel %vm105_vm0, %v99_v8, 0  ;;  %1244 = vmatpush.msra.mxu2 %v1488_v3  ;;  %v162_v12 = vsub.f32 %v104_v0, %v1488_v3  ;;  %v1500_v13 = vand.u32 4294901760, %v110_v10  ;;  %v168_v14 = vsub.f32 %v103_v1, %v1490_v4  ;;  %125 = vmatpush.msra.mxu0 %v1488_v3  ;;  %v330_v23 = vld [vmem:[#allocation7 + $0x10] sm:$0xff]  ;;  %v328_v39 = vld [vmem:[#allocation7] sm:$0xff]  ;;  %v551_v62 = vld [vmem:[#allocation8 + $0x18] sm:$0xff]  ;;  %s1227_s16 = sshll.u32 %s1427_s4, 4  ;;  %s1228_s16 = int_to_ptr.vmem [resolvable:$true] %s1227_s16 }
  0x1a   :  { %v1504_v15 = vsub.f32 %v102_v2, %v1492_v5  ;;  %v1508_v17 = vsub.f32 %v101_v6, %v1494_v9  ;;  %v1510_v18 = vand.u32 4294901760, %v107_v11  ;;  %v1522_v26 = vand.u32 4294901760, %v331_v16  ;;  %v550_v0 = vld [vmem:[#allocation8 + $0x10] sm:$0xff]  ;;  %v548_v7 = vld [vmem:[#allocation8] sm:$0xff]  ;;  %s1229_s19 = sshll.u32 %s1635_s5, 4  ;;  %s1230_s19 = int_to_ptr.hbm [resolvable:$true] %s1229_s19 }
  0x1b   :  { %1245 = vmatpush.msra.mxu2 %v1490_v4  ;;  %v163_v19 = vand.u32 4294901760, %v162_v12  ;;  %v1514_v20 = vsub.f32 %v110_v10, %v1500_v13  ;;  %v169_v21 = vand.u32 4294901760, %v168_v14  ;;  %127 = vmatpush.msra.mxu0 %v1490_v4  ;;  %v1533_v32 = vand.u32 4294901760, %v330_v23 }
  0x1c   :  { %v175_v22 = vand.u32 4294901760, %v1504_v15  ;;  %v181_v24 = vand.u32 4294901760, %v1508_v17  ;;  %v1520_v25 = vsub.f32 %v107_v11, %v1510_v18  ;;  %v382_v42 = vsub.f32 %v331_v16, %v1522_v26 }
  0x1d   :  { %1246 = vmatpush.msra.mxu2 %v1492_v5  ;;  %v164_v27 = vsub.f32 %v162_v12, %v163_v19  ;;  %v1526_v28 = vand.u32 4294901760, %v1514_v20  ;;  %v170_v29 = vsub.f32 %v168_v14, %v169_v21  ;;  %129 = vmatpush.msra.mxu0 %v1492_v5  ;;  %v1545_v43 = vand.u32 4294901760, %v329_v33 }
  0x1e   :  { %v176_v30 = vsub.f32 %v1504_v15, %v175_v22  ;;  %v1531_v31 = vand.u32 4294901760, %v1520_v25  ;;  %v182_v37 = vsub.f32 %v1508_v17, %v181_v24  ;;  %v1550_v46 = vand.u32 4294901760, %v328_v39 }
  0x1f   :  { %1247 = vmatpush.msra.mxu2 %v1494_v9  ;;  %v165_v34 = vand.u32 4294901760, %v164_v27  ;;  %v143_v35 = vsub.f32 %v1514_v20, %v1526_v28  ;;  %v171_v36 = vand.u32 4294901760, %v170_v29  ;;  %131 = vmatpush.msra.mxu0 %v1494_v9  ;;  %v388_v47 = vsub.f32 %v330_v23, %v1533_v32 }
  0x20   :  { %v135_v38 = vsub.f32 %v1520_v25, %v1531_v31  ;;  %v177_v41 = vand.u32 4294901760, %v176_v30  ;;  %v183_v45 = vand.u32 4294901760, %v182_v37  ;;  %v383_v48 = vand.u32 4294901760, %v382_v42 }
  0x21   :  { %208 = vmatpush.msrb.mxu2 %v162_v12  ;;  %277 = vmatpush.msrb.mxu0 %v163_v19  ;;  %v1542_v40 = vand.u32 4294901760, %v143_v35  ;;  %v394_v49 = vsub.f32 %v329_v33, %v1545_v43  ;;  %v389_v50 = vand.u32 4294901760, %v388_v47  ;;  %v400_v51 = vsub.f32 %v328_v39, %v1550_v46 }
  0x22   :  { %1248 = vmatpush.msra.mxu3 %v165_v34  ;;  %166 = vmatpush.msra.mxu1 %v165_v34  ;;  %v1547_v44 = vand.u32 4294901760, %v135_v38  ;;  %v384_v52 = vsub.f32 %v382_v42, %v383_v48  ;;  %v564_v63 = vand.u32 4294901760, %v551_v62  ;;  %v566_v2 = vand.u32 4294901760, %v550_v0 }
  0x23   :  { %211 = vmatpush.msrb.mxu2 %v168_v14  ;;  %281 = vmatpush.msrb.mxu0 %v169_v21  ;;  %v395_v53 = vand.u32 4294901760, %v394_v49  ;;  %v390_v54 = vsub.f32 %v388_v47, %v389_v50  ;;  %v401_v55 = vand.u32 4294901760, %v400_v51  ;;  %v570_v11 = vand.u32 4294901760, %v548_v7 }
  0x24   :  { %145 = vmatmul.f32.vlgmr.msra.gmra.mxu2 %v1542_v40  ;;  %1249 = vmatpush.msra.mxu3 %v171_v36  ;;  %v385_v56 = vand.u32 4294901760, %v384_v52  ;;  %v602_v1 = vsub.f32 %v551_v62, %v564_v63 }
  0x25   :  { %214 = vmatpush.msrb.mxu2 %v1504_v15  ;;  %172 = vmatpush.msra.mxu1 %v171_v36  ;;  %v396_v57 = vsub.f32 %v394_v49, %v395_v53  ;;  %v391_v58 = vand.u32 4294901760, %v390_v54  ;;  %v402_v59 = vsub.f32 %v400_v51, %v401_v55  ;;  %v620_v16 = vsub.f32 %v548_v7, %v570_v11 }
  0x26   :  { %1250 = vmatpush.msra.mxu3 %v177_v41  ;;  %137 = vmatmul.f32.vlgmr.msra.gmra.mxu0 %v1547_v44 }
  0x27   :  { %217 = vmatpush.msrb.mxu2 %v1508_v17  ;;  %178 = vmatpush.msra.mxu1 %v177_v41  ;;  %v397_v60 = vand.u32 4294901760, %v396_v57  ;;  %v403_v61 = vand.u32 4294901760, %v402_v59  ;;  %v621_v21 = vand.u32 4294901760, %v620_v16 }
  0x28   :  { %1251 = vmatpush.msra.mxu3 %v183_v45  ;;  %285 = vmatpush.msrb.mxu0 %v175_v22 }
  0x29   :  { %345 = vmatpush.msra.mxu2 %v1522_v26  ;;  %190 = vmatmul.f32.vlgmr.msra.gmra.mxu3 %v1500_v13  ;;  %v622_v23 = vsub.f32 %v620_v16, %v621_v21 }
  0x2a   :  { %184 = vmatpush.msra.mxu1 %v183_v45  ;;  %242 = vmatpush.msrb.mxu3 %v1488_v3 }
  0x2b   :  { %186 = vmatmul.f32.vlgmr.msra.gmra.mxu1 %v1510_v18  ;;  %347 = vmatpush.msra.mxu2 %v1533_v32 }
  0x2c   :  { %312 = vmatpush.msrb.mxu1 %v1488_v3  ;;  %220 = vmatmul.f32.vlgmr.msrb.gmra.mxu2 %v1520_v25  ;;  %v549_v3 = vld [vmem:[#allocation8 + $0x8] sm:$0xff] }
  0x2d   :  { %244 = vmatpush.msrb.mxu3 %v1490_v4  ;;  %289 = vmatpush.msrb.mxu0 %v181_v24  ;;  %v568_v6 = vand.u32 4294901760, %v549_v3  ;;  %v623_v24 = vand.u32 4294901760, %v622_v23 }
  0x2e   :  { %314 = vmatpush.msrb.mxu1 %v1490_v4  ;;  %349 = vmatpush.msra.mxu2 %v1545_v43  ;;  %v603_v4 = vand.u32 4294901760, %v602_v1 }
  0x2f   :  { %246 = vmatpush.msrb.mxu3 %v1492_v5  ;;  %291 = vmatmul.f32.vlgmr.msrb.gmra.mxu0 %v1510_v18  ;;  %v614_v10 = vsub.f32 %v549_v3, %v568_v6 }
  0x30   :  { %316 = vmatpush.msrb.mxu1 %v1492_v5  ;;  %351 = vmatpush.msra.mxu2 %v1550_v46  ;;  %v608_v5 = vsub.f32 %v550_v0, %v566_v2  ;;  %v604_v8 = vsub.f32 %v602_v1, %v603_v4 }
  0x31   :  { %248 = vmatpush.msrb.mxu3 %v1494_v9  ;;  %428 = vmatpush.msra.mxu0 %v382_v42  ;;  %v615_v15 = vand.u32 4294901760, %v614_v10 }
  0x32   :  { %252 = vmatmul.f32.vlgmr.msrb.gmra.mxu3 %v1531_v31  ;;  %318 = vmatpush.msrb.mxu1 %v1494_v9  ;;  %v609_v9 = vand.u32 4294901760, %v608_v5  ;;  %v605_v12 = vand.u32 4294901760, %v604_v8 }
  0x33   :  { %386 = vmatpush.msra.mxu3 %v385_v56  ;;  %320 = vmatmul.f32.vlgmr.msrb.gmra.mxu1 %v1510_v18  ;;  %v616_v19 = vsub.f32 %v614_v10, %v615_v15 }
  0x34   :  { %225 = vmatmul.f32.gmra.mxu2 %v1514_v20  ;;  %431 = vmatpush.msra.mxu0 %v388_v47  ;;  %v610_v14 = vsub.f32 %v608_v5, %v609_v9 }
  0x35   :  { %392 = vmatpush.msra.mxu3 %v391_v58  ;;  %462 = vmatpush.msra.mxu1 %v1522_v26  ;;  %v617_v22 = vand.u32 4294901760, %v616_v19 }
  0x36   :  { %497 = vmatpush.msrb.mxu2 %v383_v48  ;;  %434 = vmatpush.msra.mxu0 %v394_v49  ;;  %v611_v17 = vand.u32 4294901760, %v610_v14 }
  0x37   :  { %398 = vmatpush.msra.mxu3 %v397_v60  ;;  %464 = vmatpush.msra.mxu1 %v1533_v32 }
  0x38   :  { %295 = vmatmul.f32.gmra.mxu0 %v1500_v13  ;;  %501 = vmatpush.msrb.mxu2 %v389_v50 }
  0x39   :  { %404 = vmatpush.msra.mxu3 %v403_v61  ;;  %437 = vmatpush.msra.mxu0 %v400_v51 }
  0x3a   :  { %258 = vmatmul.f32.gmra.mxu3 %v1526_v28  ;;  %466 = vmatpush.msra.mxu1 %v1545_v43 }
  0x3b   :  { %324 = vmatmul.f32.gmra.mxu1 %v1500_v13  ;;  %505 = vmatpush.msrb.mxu2 %v395_v53 }
  0x3c   :  { %357 = vmatmul.f32.vlgmr.msra.gmra.mxu2 %v1547_v44  ;;  %468 = vmatpush.msra.mxu1 %v1550_v46 }
  0x3d   :  { %509 = vmatpush.msrb.mxu2 %v401_v55  ;;  %532 = vmatpush.msrb.mxu3 %v1522_v26 }
  0x3e   :  { %565 = vmatpush.msrb.mxu0 %v564_v63  ;;  %606 = vmatpush.msrb.mxu1 %v605_v12 }
  0x3f   :  { %534 = vmatpush.msrb.mxu3 %v1533_v32  ;;  %648 = vmatpush.msra.mxu2 %v602_v1 }
  0x40   :  { %440 = vmatmul.f32.vlgmr.msra.gmra.mxu0 %v1520_v25  ;;  %612 = vmatpush.msrb.mxu1 %v611_v17 }
  0x41   :  { %536 = vmatpush.msrb.mxu3 %v1545_v43  ;;  %567 = vmatpush.msrb.mxu0 %v566_v2 }
  0x42   :  { %406 = vmatmul.f32.vlgmr.msra.gmra.mxu3 %v1510_v18  ;;  %651 = vmatpush.msra.mxu2 %v608_v5 }
  0x43   :  { %472 = vmatmul.f32.vlgmr.msra.gmra.mxu1 %v1531_v31  ;;  %538 = vmatpush.msrb.mxu3 %v1550_v46 }
  0x44   :  { %365 = vmatmul.f32.gmra.mxu2 %v1542_v40  ;;  %569 = vmatpush.msrb.mxu0 %v568_v6 }
  0x45   :  { %682 = vmatpush.msra.mxu3 %v564_v63  ;;  %654 = vmatpush.msra.mxu2 %v614_v10 }
  0x46   :  { %571 = vmatpush.msrb.mxu0 %v570_v11  ;;  %618 = vmatpush.msrb.mxu1 %v617_v22 }
  0x47   :  { %684 = vmatpush.msra.mxu3 %v566_v2  ;;  %657 = vmatpush.msra.mxu2 %v620_v16 }
  0x48   :  { %445 = vmatmul.f32.gmra.mxu0 %v1514_v20  ;;  %624 = vmatpush.msrb.mxu1 %v623_v24 }
  0x49   :  { %686 = vmatpush.msra.mxu3 %v568_v6  ;;  %717 = vmatpush.msra.mxu0 %v603_v4 }
  0x4a   :  { %410 = vmatmul.f32.gmra.mxu3 %v1500_v13  ;;  %752 = vmatpush.msra.mxu1 %v564_v63 }
  0x4b   :  { %478 = vmatmul.f32.gmra.mxu1 %v1526_v28  ;;  %688 = vmatpush.msra.mxu3 %v570_v11 }
  0x4c   :  { %511 = vmatmul.f32.vlgmr.msrb.gmra.mxu2 %v1510_v18  ;;  %721 = vmatpush.msra.mxu0 %v609_v9 }
  0x4d   :  { %754 = vmatpush.msra.mxu1 %v566_v2 }
  0x4e   :  { %725 = vmatpush.msra.mxu0 %v615_v15 }
  0x4f   :  { %756 = vmatpush.msra.mxu1 %v568_v6 }
  0x50   :  { %577 = vmatmul.f32.vlgmr.msrb.gmra.mxu0 %v1547_v44 }
  0x51   :  { %729 = vmatpush.msra.mxu0 %v621_v21  ;;  %758 = vmatpush.msra.mxu1 %v570_v11 }
  0x52   :  { %540 = vmatmul.f32.vlgmr.msrb.gmra.mxu3 %v1510_v18 }
  0x53   :  { %626 = vmatmul.f32.vlgmr.msrb.gmra.mxu1 %v1510_v18 }
  0x54   :  { %515 = vmatmul.f32.gmra.mxu2 %v1500_v13 }
  0x58   :  { %585 = vmatmul.f32.gmra.mxu0 %v1542_v40 }
  0x5a   :  { %544 = vmatmul.f32.gmra.mxu3 %v1500_v13 }
  0x5b   :  { %630 = vmatmul.f32.gmra.mxu1 %v1500_v13 }
  0x5c   :  { %660 = vmatmul.f32.vlgmr.msra.gmra.mxu2 %v1520_v25 }
  0x60   :  { %731 = vmatmul.f32.vlgmr.msra.gmra.mxu0 %v1510_v18 }
  0x62   :  { %692 = vmatmul.f32.vlgmr.msra.gmra.mxu3 %v1531_v31 }
  0x63   :  { %760 = vmatmul.f32.vlgmr.msra.gmra.mxu1 %v1510_v18 }
  0x64   :  { %665 = vmatmul.f32.gmra.mxu2 %v1514_v20 }
  0x68   :  { %735 = vmatmul.f32.gmra.mxu0 %v1500_v13 }
  0x6a   :  { %698 = vmatmul.f32.gmra.mxu3 %v1526_v28 }
  0x6b   :  { %764 = vmatmul.f32.gmra.mxu1 %v1500_v13 }
  0xa3   :  { %v138_v25 = vpop.f32.mrf.mxu0 }
  0xa7   :  { %v146_v26 = vpop.f32.mrf.mxu2 }
  0xa8   :  { %v187_v29 = vpop.f32.mrf.mxu1 }
  0xa9   :  { %v188_v36 = vadd.f32 %v187_v29, %v138_v25 }
  0xac   :  { %v191_v27 = vpop.f32.mrf.mxu3  ;;  %v292_v32 = vpop.f32.mrf.mxu0 }
  0xad   :  { %v192_v44 = vadd.f32 %v191_v27, %v146_v26 }
  0xaf   :  { %v221_v30 = vpop.f32.mrf.mxu2 }
  0xb0   :  { %v321_v33 = vpop.f32.mrf.mxu1  ;;  %v222_v38 = vadd.f32 %v221_v30, %v188_v36 }
  0xb5   :  { %v253_v31 = vpop.f32.mrf.mxu3  ;;  %v296_v34 = vpop.f32.mrf.mxu0 }
  0xb6   :  { %v254_v41 = vadd.f32 %v253_v31, %v222_v38 }
  0xb7   :  { %v226_v20 = vpop.f32.mrf.mxu2 }
  0xb8   :  { %v325_v37 = vpop.f32.mrf.mxu1  ;;  %v293_v45 = vadd.f32 %v292_v32, %v254_v41  ;;  %v227_v48 = vadd.f32 %v226_v20, %v192_v44 }
  0xba   :  { %v322_v50 = vadd.f32 %v321_v33, %v293_v45 }
  0xbc   :  { %v769_v55 = vsel %vm105_vm0, %v322_v50, 0 }
  0xbd   :  { %v259_v28 = vpop.f32.mrf.mxu3  ;;  %v441_v42 = vpop.f32.mrf.mxu0  ;;  %v798_v61 = vand.u32 4294901760, %v769_v55 }
  0xbe   :  { %v260_v51 = vadd.f32 %v259_v28, %v227_v48 }
  0xbf   :  { %v358_v35 = vpop.f32.mrf.mxu2  ;;  %v799_v2 = vsub.f32 %v769_v55, %v798_v61 }
  0xc0   :  { %v473_v18 = vpop.f32.mrf.mxu1  ;;  %v297_v56 = vadd.f32 %v296_v34, %v260_v51 }
  0xc1   :  { %v800_v8 = vand.u32 4294901760, %v799_v2 }
  0xc2   :  { %v326_v62 = vadd.f32 %v325_v37, %v297_v56 }
  0xc3   :  { %v801_v16 = vsub.f32 %v799_v2, %v800_v8 }
  0xc4   :  { %v772_v4 = vsel %vm105_vm0, %v326_v62, 0 }
  0xc5   :  { %v407_v39 = vpop.f32.mrf.mxu3  ;;  %v446_v53 = vpop.f32.mrf.mxu0  ;;  %v806_v9 = vand.u32 4294901760, %v772_v4  ;;  %v802_v22 = vand.u32 4294901760, %v801_v16 }
  0xc6   :  { %v408_v43 = vadd.f32 %v407_v39, %v358_v35 }
  0xc7   :  { %v366_v40 = vpop.f32.mrf.mxu2  ;;  %v807_v15 = vsub.f32 %v772_v4, %v806_v9 }
  0xc8   :  { %v442_v47 = vadd.f32 %v441_v42, %v408_v43  ;;  %v479_v60 = vpop.f32.mrf.mxu1 }
  0xc9   :  { %v808_v23 = vand.u32 4294901760, %v807_v15 }
  0xca   :  { %v474_v13 = vadd.f32 %v473_v18, %v442_v47 }
  0xcb   :  { %v809_v25 = vsub.f32 %v807_v15, %v808_v23 }
  0xcd   :  { %v411_v46 = vpop.f32.mrf.mxu3  ;;  %v810_v29 = vand.u32 4294901760, %v809_v25  ;;  %v578_v30 = vpop.f32.mrf.mxu0 }
  0xce   :  { %v412_v52 = vadd.f32 %v411_v46, %v366_v40 }
  0xcf   :  { %v512_v49 = vpop.f32.mrf.mxu2 }
  0xd0   :  { %v513_v54 = vadd.f32 %v512_v49, %v474_v13  ;;  %v447_v58 = vadd.f32 %v446_v53, %v412_v52  ;;  %v627_v31 = vpop.f32.mrf.mxu1 }
  0xd1   :  { %v628_v28 = vadd.f32 %v627_v31, %v578_v30 }
  0xd2   :  { %v480_v0 = vadd.f32 %v479_v60, %v447_v58 }
  0xd5   :  { %v541_v57 = vpop.f32.mrf.mxu3  ;;  %v586_v32 = vpop.f32.mrf.mxu0 }
  0xd6   :  { %v542_v59 = vadd.f32 %v541_v57, %v513_v54 }
  0xd7   :  { %v516_v63 = vpop.f32.mrf.mxu2 }
  0xd8   :  { %v775_v1 = vsel %vm105_vm0, %v542_v59, 0  ;;  %v517_v3 = vadd.f32 %v516_v63, %v480_v0  ;;  %v631_v34 = vpop.f32.mrf.mxu1 }
  0xd9   :  { %v796_v5 = vand.u32 4294901760, %v775_v1  ;;  %v632_v36 = vadd.f32 %v631_v34, %v586_v32 }
  0xdb   :  { %v836_v11 = vsub.f32 %v775_v1, %v796_v5 }
  0xdd   :  { %v545_v6 = vpop.f32.mrf.mxu3  ;;  %v837_v19 = vand.u32 4294901760, %v836_v11  ;;  %v732_v35 = vpop.f32.mrf.mxu0 }
  0xde   :  { %v546_v7 = vadd.f32 %v545_v6, %v517_v3 }
  0xdf   :  { %v838_v26 = vsub.f32 %v836_v11, %v837_v19  ;;  %v661_v20 = vpop.f32.mrf.mxu2 }
  0xe0   :  { %v778_v10 = vsel %vm105_vm0, %v546_v7, 0  ;;  %v662_v37 = vadd.f32 %v661_v20, %v628_v28  ;;  %v761_v42 = vpop.f32.mrf.mxu1 }
  0xe1   :  { %v794_v12 = vand.u32 4294901760, %v778_v10  ;;  %v839_v27 = vand.u32 4294901760, %v838_v26 }
  0xe3   :  { %v830_v14 = vsub.f32 %v778_v10, %v794_v12  ;;  %795 = vmatpush.xpose.msrb.mxu2 %v794_v12  ;;  %896 = vmatpush.xpose.msrb.mxu1 %v794_v12  ;;  %v972_v10 = vld [vmem:[#allocation10] sm:$0xff] }
  0xe5   :  { %866 = vmatpush.xpose.msrb.mxu0 %v830_v14  ;;  %v831_v17 = vand.u32 4294901760, %v830_v14  ;;  %v693_v33 = vpop.f32.mrf.mxu3  ;;  %v736_v45 = vpop.f32.mrf.mxu0 }
  0xe6   :  { %v694_v39 = vadd.f32 %v693_v33, %v662_v37 }
  0xe7   :  { %797 = vmatpush.xpose.msrb.mxu2 %v796_v5  ;;  %898 = vmatpush.xpose.msrb.mxu1 %v796_v5  ;;  %v832_v21 = vsub.f32 %v830_v14, %v831_v17  ;;  %v666_v38 = vpop.f32.mrf.mxu2 }
  0xe8   :  { %v667_v40 = vadd.f32 %v666_v38, %v632_v36  ;;  %v733_v43 = vadd.f32 %v732_v35, %v694_v39  ;;  %v765_v47 = vpop.f32.mrf.mxu1 }
  0xe9   :  { %869 = vmatpush.xpose.msrb.mxu0 %v836_v11  ;;  %v833_v24 = vand.u32 4294901760, %v832_v21 }
  0xea   :  { %803 = vmatmul.f32.vlgmr.msrb.gmra.mxu2 %v802_v22  ;;  %902 = vmatmul.f32.vlgmr.msrb.gmra.mxu1 %v800_v8  ;;  %v762_v18 = vadd.f32 %v761_v42, %v733_v43 }
  0xeb   :  { %929 = vmatpush.xpose.msra.mxu2 %v831_v17  ;;  %834 = vmatpush.xpose.msrb.mxu3 %v833_v24 }
  0xec   :  { %872 = vmatmul.f32.vlgmr.msrb.gmra.mxu0 %v799_v2  ;;  %v1047_v48 = vand.u32 4294901760, %v762_v18 }
  0xed   :  { %v699_v41 = vpop.f32.mrf.mxu3 }
  0xee   :  { %v700_v44 = vadd.f32 %v699_v41, %v667_v40  ;;  %v1087_v51 = vsub.f32 %v762_v18, %v1047_v48 }
  0xef   :  { %933 = vmatpush.xpose.msra.mxu2 %v837_v19  ;;  %840 = vmatpush.xpose.msrb.mxu3 %v839_v27 }
  0xf0   :  { %v737_v46 = vadd.f32 %v736_v45, %v700_v44  ;;  %v1088_v54 = vand.u32 4294901760, %v1087_v51 }
  0xf2   :  { %811 = vmatmul.f32.gmra.mxu2 %v810_v29  ;;  %842 = vmatmul.f32.vlgmr.msrb.gmra.mxu3 %v798_v61  ;;  %v766_v49 = vadd.f32 %v765_v47, %v737_v46  ;;  %v1089_v56 = vsub.f32 %v1087_v51, %v1088_v54 }
  0xf3   :  { %958 = vmatpush.xpose.msra.mxu3 %v794_v12  ;;  %908 = vmatmul.f32.gmra.mxu1 %v808_v23  ;;  %v973_v23 = vld [vmem:[#allocation10 + $0x8] sm:$0xff] }
  0xf4   :  { %877 = vmatmul.f32.gmra.mxu0 %v807_v15  ;;  %v1045_v50 = vand.u32 4294901760, %v766_v49  ;;  %v1090_v57 = vand.u32 4294901760, %v1089_v56 }
  0xf6   :  { %v1081_v13 = vsub.f32 %v766_v49, %v1045_v50  ;;  %1046 = vmatpush.msra.mxu0 %v1045_v50 }
  0xf7   :  { %960 = vmatpush.xpose.msra.mxu3 %v796_v5 }
  0xf8   :  { %v1082_v52 = vand.u32 4294901760, %v1081_v13  ;;  %1117 = vmatpush.msrb.mxu2 %v1081_v13  ;;  %1048 = vmatpush.msra.mxu0 %v1047_v48 }
  0xfa   :  { %846 = vmatmul.f32.gmra.mxu3 %v806_v9  ;;  %935 = vmatmul.f32.vlgmr.msra.gmra.mxu2 %v798_v61  ;;  %v1083_v53 = vsub.f32 %v1081_v13, %v1082_v52 }
  0xfb   :  { %1147 = vmatpush.msrb.mxu3 %v1045_v50  ;;  %1120 = vmatpush.msrb.mxu2 %v1087_v51 }
  0xfc   :  { %1180 = vmatpush.msrb.mxu0 %v1082_v52  ;;  %v1084_v55 = vand.u32 4294901760, %v1083_v53 }
  0xfd   :  { %1149 = vmatpush.msrb.mxu3 %v1047_v48 }
  0xfe   :  { %1184 = vmatpush.msrb.mxu0 %v1088_v54  ;;  %1085 = vmatpush.msra.mxu1 %v1084_v55 }
 0x100   :  { %1091 = vmatpush.msra.mxu1 %v1090_v57 }
 0x102   :  { %939 = vmatmul.f32.gmra.mxu2 %v806_v9  ;;  %962 = vmatmul.f32.vlgmr.msra.gmra.mxu3 %v798_v61 }
 0x103   :  { %1209 = vmatpush.msrb.mxu1 %v1045_v50 }
 0x105   :  { %1211 = vmatpush.msrb.mxu1 %v1047_v48 }
 0x10a   :  { %966 = vmatmul.f32.gmra.mxu3 %v806_v9 }
 0x167   :  { %v903_v1 = vpop.f32.mrf.mxu1 }
 0x169   :  { %v873_v62 = vpop.f32.mrf.mxu0 }
 0x16d   :  { %v804_v58 = vpop.f32.mrf.mxu2 }
 0x170   :  { %v909_v12 = vpop.f32.mrf.mxu1 }
 0x171   :  { %v878_v6 = vpop.f32.mrf.mxu0 }
 0x175   :  { %v812_v59 = vpop.f32.mrf.mxu2  ;;  %v843_v60 = vpop.f32.mrf.mxu3 }
 0x176   :  { %v844_v61 = vadd.f32 %v843_v60, %v804_v58 }
 0x178   :  { %v874_v0 = vadd.f32 %v873_v62, %v844_v61 }
 0x17a   :  { %v904_v4 = vadd.f32 %v903_v1, %v874_v0 }
 0x17d   :  { %v847_v63 = vpop.f32.mrf.mxu3  ;;  %v936_v2 = vpop.f32.mrf.mxu2 }
 0x17e   :  { %v848_v3 = vadd.f32 %v847_v63, %v812_v59  ;;  %v937_v5 = vadd.f32 %v936_v2, %v904_v4 }
 0x180   :  { %v879_v8 = vadd.f32 %v878_v6, %v848_v3 }
 0x182   :  { %v910_v15 = vadd.f32 %v909_v12, %v879_v8 }
 0x185   :  { %v963_v7 = vpop.f32.mrf.mxu3  ;;  %v940_v14 = vpop.f32.mrf.mxu2 }
 0x186   :  { %v964_v9 = vadd.f32 %v963_v7, %v937_v5  ;;  %v941_v17 = vadd.f32 %v940_v14, %v910_v15 }
 0x188   :  { %v970_v11 = vmul.f32 0.17677669, %v964_v9 }
 0x18a   :  { %v974_v16 = vadd.f32 %v972_v10, %v970_v11 }
 0x18c   :  { %v977_v19 = vsel %vm976_vm1, %v974_v16, -inf }
 0x18d   :  { %v967_v21 = vpop.f32.mrf.mxu3  ;;  %978 = vmax.xlane.f32.xlu0 %v977_v19 }
 0x18e   :  { %v968_v22 = vadd.f32 %v967_v21, %v941_v17 }
 0x190   :  { %v971_v24 = vmul.f32 0.17677669, %v968_v22 }
 0x192   :  { %v975_v26 = vadd.f32 %v973_v23, %v971_v24 }
 0x194   :  { %v980_v25 = vsel %vm976_vm1, %v975_v26, -inf }
 0x195   :  { %981 = vmax.xlane.f32.xlu0 %v980_v25 }
 0x200   :  { %v979_v27 = vpop.xlane.xlu0 %978 }
 0x201   :  { %v983_v29 = vsub.f32 %v974_v16, %v979_v27 }
 0x203   :  { %v985_v30 = vmul.f32 1.442695, %v983_v29 }
 0x205   :  { %1260 = vpow2.f32 %v985_v30 }
 0x208   :  { %v982_v31 = vpop.xlane.xlu0 %981 }
 0x209   :  { %v984_v32 = vsub.f32 %v975_v26, %v982_v31 }
 0x20b   :  { %v1261_v20 = vpop.eup %1260  ;;  %v987_v33 = vmul.f32 1.442695, %v984_v32 }
 0x20c   :  { %v989_v28 = vsel %vm976_vm1, %v1261_v20, 0.0 }
 0x20d   :  { %1262 = vpow2.f32 %v987_v33  ;;  %990 = vadd.xlane.f32.xlu1 %v989_v28 }
 0x213   :  { %v1263_v34 = vpop.eup %1262 }
 0x214   :  { %v992_v35 = vsel %vm976_vm1, %v1263_v34, 0.0 }
 0x215   :  { %993 = vadd.xlane.f32.xlu1 %v992_v35 }
 0x280   :  { %v991_v36 = vpop.xlane.xlu1 %990 }
 0x281   :  { %1264 = vrcp.f32 %v991_v36  ;;  %v1006_v41 = vand.u32 2147483648, %v991_v36  ;;  %v1004_v43 = vand.u32 2147483647, %v991_v36  ;;  %vm1000_vm3 = vweird.f32 %v991_v36 }
 0x283   :  { %v1007_v18 = vor.u32 1.1754944e-38, %v1006_v41  ;;  %vm1005_vm5 = vcmp.eq.f32.partialorder %v1004_v43, 8.507059e+37 }
 0x287   :  { %v1265_v37 = vpop.eup %1264 }
 0x288   :  { %v996_v38 = vmul.f32 %v1265_v37, %v991_v36  ;;  %v994_v39 = vpop.xlane.xlu1 %993  ;;  %vm1001_vm2 = vweird.f32 %v1265_v37 }
 0x289   :  { %1266 = vrcp.f32 %v994_v39  ;;  %vm1002_vm4 = vmor %vm1000_vm3, %vm1001_vm2  ;;  %v1021_v51 = vand.u32 2147483648, %v994_v39  ;;  %v1019_v52 = vand.u32 2147483647, %v994_v39  ;;  %vm1015_vm7 = vweird.f32 %v994_v39 }
 0x28a   :  { %v997_v40 = vsub.f32 1.0, %v996_v38 }
 0x28b   :  { %v1022_v56 = vor.u32 1.1754944e-38, %v1021_v51  ;;  %vm1020_vm9 = vcmp.eq.f32.partialorder %v1019_v52, 8.507059e+37 }
 0x28c   :  { %v998_v42 = vmul.f32 %v1265_v37, %v997_v40 }
 0x28e   :  { %v999_v44 = vadd.f32 %v1265_v37, %v998_v42 }
 0x28f   :  { %v1267_v45 = vpop.eup %1266 }
 0x290   :  { %v1003_v46 = vsel %vm1002_vm4, %v1265_v37, %v999_v44  ;;  %v1011_v47 = vmul.f32 %v1267_v45, %v994_v39  ;;  %vm1016_vm6 = vweird.f32 %v1267_v45 }
 0x291   :  { %v1008_v48 = vsel %vm1005_vm5, %v1007_v18, %v1003_v46  ;;  %vm1017_vm8 = vmor %vm1015_vm7, %vm1016_vm6 }
 0x292   :  { %v1012_v49 = vsub.f32 1.0, %v1011_v47  ;;  %v1009_v50 = vmul.f32 %v1261_v20, %v1008_v48 }
 0x294   :  { %v1013_v13 = vmul.f32 %v1267_v45, %v1012_v49  ;;  %v1026_v53 = vsel %vm976_vm1, %v1009_v50, 0 }
 0x295   :  { %v1049_v54 = vand.u32 4294901760, %v1026_v53 }
 0x296   :  { %v1014_v55 = vadd.f32 %v1267_v45, %v1013_v13 }
 0x297   :  { %1093 = vmatmul.f32.vlgmr.msra.gmra.mxu1 %v1049_v54  ;;  %v1050_v57 = vsub.f32 %v1026_v53, %v1049_v54 }
 0x298   :  { %v1018_v58 = vsel %vm1017_vm8, %v1267_v45, %v1014_v55 }
 0x299   :  { %v1023_v59 = vsel %vm1020_vm9, %v1022_v56, %v1018_v58  ;;  %1123 = vmatmul.f32.vlgmr.msrb.gmra.mxu2 %v1050_v57  ;;  %v1051_v60 = vand.u32 4294901760, %v1050_v57 }
 0x29a   :  { %v1024_v61 = vmul.f32 %v1263_v34, %v1023_v59 }
 0x29b   :  { %1153 = vmatmul.f32.vlgmr.msrb.gmra.mxu3 %v1051_v60  ;;  %v1052_v62 = vsub.f32 %v1050_v57, %v1051_v60 }
 0x29c   :  { %v1029_v63 = vsel %vm976_vm1, %v1024_v61, 0 }
 0x29d   :  { %v1053_v0 = vand.u32 4294901760, %v1052_v62  ;;  %v1057_v1 = vand.u32 4294901760, %v1029_v63 }
 0x29f   :  { %1054 = vmatmul.f32.vlgmr.msra.gmra.mxu0 %v1053_v0  ;;  %1097 = vmatmul.f32.gmra.mxu1 %v1057_v1  ;;  %v1058_v2 = vsub.f32 %v1029_v63, %v1057_v1 }
 0x2a1   :  { %1128 = vmatmul.f32.gmra.mxu2 %v1058_v2  ;;  %v1059_v3 = vand.u32 4294901760, %v1058_v2 }
 0x2a3   :  { %1159 = vmatmul.f32.gmra.mxu3 %v1059_v3  ;;  %v1060_v4 = vsub.f32 %v1058_v2, %v1059_v3 }
 0x2a5   :  { %v1061_v5 = vand.u32 4294901760, %v1060_v4 }
 0x2a7   :  { %1062 = vmatmul.f32.gmra.mxu0 %v1061_v5  ;;  %1213 = vmatmul.f32.vlgmr.msrb.gmra.mxu1 %v1049_v54 }
 0x2af   :  { %1186 = vmatmul.f32.vlgmr.msrb.gmra.mxu0 %v1049_v54  ;;  %1217 = vmatmul.f32.gmra.mxu1 %v1057_v1 }
 0x2b7   :  { %1190 = vmatmul.f32.gmra.mxu0 %v1057_v1 }
 0x314   :  { %v1094_v6 = vpop.f32.mrf.mxu1 }
 0x31c   :  { %v1055_v7 = vpop.f32.mrf.mxu0  ;;  %v1098_v8 = vpop.f32.mrf.mxu1 }
 0x31d   :  { %v1095_v9 = vadd.f32 %v1094_v6, %v1055_v7  ;;  %v1124_v10 = vpop.f32.mrf.mxu2 }
 0x31e   :  { %v1154_v14 = vpop.f32.mrf.mxu3 }
 0x31f   :  { %v1125_v12 = vadd.f32 %v1124_v10, %v1095_v9 }
 0x321   :  { %v1155_v15 = vadd.f32 %v1154_v14, %v1125_v12 }
 0x324   :  { %v1063_v11 = vpop.f32.mrf.mxu0  ;;  %v1214_v17 = vpop.f32.mrf.mxu1 }
 0x325   :  { %v1099_v16 = vadd.f32 %v1098_v8, %v1063_v11  ;;  %v1129_v22 = vpop.f32.mrf.mxu2 }
 0x326   :  { %v1160_v26 = vpop.f32.mrf.mxu3 }
 0x327   :  { %v1130_v23 = vadd.f32 %v1129_v22, %v1099_v16 }
 0x329   :  { %v1161_v25 = vadd.f32 %v1160_v26, %v1130_v23 }
 0x32c   :  { %v1187_v19 = vpop.f32.mrf.mxu0  ;;  %v1218_v30 = vpop.f32.mrf.mxu1 }
 0x32d   :  { %v1188_v21 = vadd.f32 %v1187_v19, %v1155_v15 }
 0x32f   :  { %v1215_v24 = vadd.f32 %v1214_v17, %v1188_v21 }
 0x331   :  { %1221 = vst.msk [vmem:[#allocation11] sm:$0xff] %vm105_vm0, %v1215_v24 }
 0x334   :  { %v1191_v27 = vpop.f32.mrf.mxu0 }
 0x335   :  { %v1192_v29 = vadd.f32 %v1191_v27, %v1161_v25 }
 0x337   :  { %v1219_v31 = vadd.f32 %v1218_v30, %v1192_v29 }
 0x339   :  { %1222 = vst.msk [vmem:[#allocation11 + $0x8] sm:$0xff] %vm105_vm0, %v1219_v31 }
 0x33a   :  { %1235 = dma.vmem_to_hbm [thread:$0]  %s1228_s16, 256, %s1230_s19, [#allocation4], %s1421_s26, %s1421_s26, %s1422_s27  }
 0x33b   :  { %1418 = dma.done.wait [#allocation4], 256  }
 0x33c   :  { %1419 = vsyncadd [#allocation4], 4294967040 }
 0x33d   :  { %1240 = vsyncpa [#allocation3], 1 }
 0x33e   :  { %1241 = vsyncpa [#allocation6], 1 }
 0x33f   :  { %1242 = vsyncpa [#allocation9], 1 }
 0x340   :  { %1243 = vsyncpa [#allocation4], 1 }

</bundles_post_ra>
